<compile_context>
chip_gen: v5e
topology: v5e:2x2
jax: 0.10.0
libtpu: 0.0.40
codegen_flags: <defaults>
</compile_context>

<pallas_src>
import math
import jax
import jax.numpy as jnp
from jax import lax
from jax.experimental import pallas as pl
from jax.experimental.pallas import tpu as pltpu


def _make_attention_kernel(B, S, D, A, Apad):
    def kernel(x_ref, wqkv_ref, bqkv_ref, out_ref, attn_ref):
        # x_ref: (B, S, D); wqkv_ref: (D, 3*Apad); bqkv_ref: (1, 3*Apad)
        # Merge (B, S) -> B*S sublanes (cheap, tile-aligned) for one 2-D matmul.
        x2 = x_ref[...].reshape(B * S, D)

        # Fused QKV projection: one wide MXU matmul (f32 in / f32 acc).
        # TODO(synk): at realistic D/A, feed bf16 operands here (MXU-native on
        # v6e/v7x) with preferred_element_type=f32.
        qkv = jnp.dot(x2, wqkv_ref[...],
                      preferred_element_type=jnp.float32) + bqkv_ref[...]

        # Tile-aligned segment slices (offsets 0, Apad, 2*Apad; Apad % 128 == 0).
        q = qkv[:, 0 * Apad:1 * Apad].reshape(B, S, Apad)
        k = qkv[:, 1 * Apad:2 * Apad].reshape(B, S, Apad)
        v = qkv[:, 2 * Apad:3 * Apad].reshape(B, S, Apad)

        # scores[b,s,t] = sum_a q[b,s,a] * k[b,t,a]   (scale already folded into q)
        # Contract the last dims of both operands natively on the MXU — no
        # explicit k.T (avoids an XLU transpose / relayout).
        scores = lax.dot_general(
            q, k, (((2,), (2,)), ((0,), (0,))),
            preferred_element_type=jnp.float32)

        # Numerically stable softmax, all f32. Exact divide: the weights are a
        # returned contract output and must sum to 1 per row.
        m = jnp.max(scores, axis=-1, keepdims=True)
        e = jnp.exp(scores - m)
        denom = jnp.sum(e, axis=-1, keepdims=True)
        weights = e / denom

        # attended[b,s,a] = sum_t w[b,s,t] * v[b,t,a]  (f32 MXU pass, f32 acc).
        attended = lax.dot_general(
            weights, v, (((2,), (1,)), ((0,), (0,))),
            preferred_element_type=jnp.float32)

        # Padded columns of v are zero -> attended[..., A:] is zero; drop them.
        out_ref[...] = attended[:, :, :A].astype(out_ref.dtype)
        # Module contract requires returning the attention weights (f32).
        # Lane-sparse when S < 128 — acceptable at these shapes.
        attn_ref[...] = weights.astype(attn_ref.dtype)

    return kernel


def fuse_attention_params(wq, bq, wk, bk, wv, bv, attention_size):
    """One-time parameter prep (call once, not per forward).

    - folds 1/sqrt(A) into the Q projection,
    - zero-pads each projection to a 128-lane boundary,
    - concatenates into a single (D, 3*Apad) weight / (1, 3*Apad) bias.
    """
    A = attention_size
    D = wq.shape[0]
    inv_scale = 1.0 / math.sqrt(float(A))
    Apad = max(128, ((A + 127) // 128) * 128)

    def pad(w, b):
        wp = jnp.zeros((D, Apad), w.dtype).at[:, :A].set(w)
        bp = jnp.zeros((Apad,), b.dtype).at[:A].set(b)
        return wp, bp

    wqp, bqp = pad(wq * inv_scale, bq * inv_scale)
    wkp, bkp = pad(wk, bk)
    wvp, bvp = pad(wv, bv)

    wqkv = jnp.concatenate([wqp, wkp, wvp], axis=1)            # (D, 3*Apad)
    bqkv = jnp.concatenate([bqp, bkp, bvp]).reshape(1, 3 * Apad)
    return wqkv, bqkv


def attention_mechanism(x, wqkv, bqkv, attention_size):
    """x: (B, S, D) f32; wqkv: (D, 3*Apad); bqkv: (1, 3*Apad) from fuse_attention_params."""
    B, S, D = x.shape
    A = attention_size
    Apad = bqkv.shape[-1] // 3

    # Single grid-free invocation: everything fits comfortably in VMEM at these
    # shapes, so we avoid per-grid-step (~0.35 us) overhead entirely.
    # TODO(synk): flash-style tiled path for large S — grid over (B, S//tq, S//tk)
    # with online softmax, a "parallel" batch/query axis (v7x 2-TC sharding),
    # tiles budgeted against v7x's 64 MiB VMEM, and (if the contract allows)
    # LSE instead of the full (B,S,S) weight matrix to avoid O(S^2) writeback.
    out, attn = pl.pallas_call(
        _make_attention_kernel(B, S, D, A, Apad),
        out_shape=(
            jax.ShapeDtypeStruct((B, S, A), jnp.float32),
            jax.ShapeDtypeStruct((B, S, S), jnp.float32),
        ),
        in_specs=[
            pl.BlockSpec(memory_space=pltpu.MemorySpace.VMEM),   # x
            pl.BlockSpec(memory_space=pltpu.MemorySpace.VMEM),   # Wqkv (fused, padded)
            pl.BlockSpec(memory_space=pltpu.MemorySpace.VMEM),   # bqkv (fused, padded)
        ],
        out_specs=(
            pl.BlockSpec(memory_space=pltpu.MemorySpace.VMEM),   # attended values
            pl.BlockSpec(memory_space=pltpu.MemorySpace.VMEM),   # attention weights
        ),
    )(x, wqkv, bqkv)
    return out, attn


def _reference(x, wq, bq, wk, bk, wv, bv, attention_size):
    scale = math.sqrt(float(attention_size))
    q = x @ wq + bq
    k = x @ wk + bk
    v = x @ wv + bv
    scores = jnp.einsum("bsa,bta->bst", q, k) / scale
    w = jax.nn.softmax(scores, axis=-1)
    return jnp.einsum("bst,bta->bsa", w, v), w


if __name__ == "__main__":
    B, S, D, A = 2, 8, 32, 64   # batch, seq, input_size, attention_size

    key = jax.random.PRNGKey(0)
    kx, kq, kk_, kv, kbq, kbk, kbv = jax.random.split(key, 7)

    x = jax.random.normal(kx, (B, S, D), dtype=jnp.float32)
    # Deterministic parameter init (Linear weights stored pre-transposed as (D, A)).
    wq = jax.random.normal(kq, (D, A), dtype=jnp.float32) * 0.1
    wk = jax.random.normal(kk_, (D, A), dtype=jnp.float32) * 0.1
    wv = jax.random.normal(kv, (D, A), dtype=jnp.float32) * 0.1
    bq = jax.random.normal(kbq, (A,), dtype=jnp.float32) * 0.01
    bk = jax.random.normal(kbk, (A,), dtype=jnp.float32) * 0.01
    bv = jax.random.normal(kbv, (A,), dtype=jnp.float32) * 0.01

    # One-time parameter fusion (hoisted out of the forward path).
    wqkv, bqkv = fuse_attention_params(wq, bq, wk, bk, wv, bv, A)
    wqkv, bqkv = jax.block_until_ready((wqkv, bqkv))

    out, attn = attention_mechanism(x, wqkv, bqkv, A)
    jax.block_until_ready((out, attn))

    ref_out, ref_attn = _reference(x, wq, bq, wk, bk, wv, bv, A)
    assert out.shape == (B, S, A) and attn.shape == (B, S, S)
    # All-f32 path with exact softmax divide: tight tolerances.
    assert jnp.allclose(attn, ref_attn, atol=1e-5, rtol=1e-5)
    assert jnp.allclose(out, ref_out, atol=1e-4, rtol=1e-4)

    print("KERNEL_OK")
</pallas_src>

<mosaic_0001>
module attributes {stable_mosaic.version = 11 : i64} {
  func.func @kernel(%arg0: memref<2x8x32xf32, #tpu.memory_space<vmem>>, %arg1: memref<32x384xf32, #tpu.memory_space<vmem>>, %arg2: memref<1x384xf32, #tpu.memory_space<vmem>>, %arg3: memref<2x8x64xf32, #tpu.memory_space<vmem>>, %arg4: memref<2x8x8xf32, #tpu.memory_space<vmem>>) attributes {dimension_semantics = [], scalar_prefetch = 0 : i64, scratch_operands = 0 : i64, tpu.core_type = #tpu.core_type<tc>} {
    %c0 = arith.constant 0 : index
    %c0_0 = arith.constant 0 : index
    %c0_1 = arith.constant 0 : index
    %0 = vector.load %arg0[%c0, %c0_0, %c0_1] : memref<2x8x32xf32, #tpu.memory_space<vmem>>, vector<2x8x32xf32>
    %1 = vector.shape_cast %0 : vector<2x8x32xf32> to vector<16x32xf32>
    %c0_2 = arith.constant 0 : index
    %c0_3 = arith.constant 0 : index
    %2 = vector.load %arg1[%c0_2, %c0_3] : memref<32x384xf32, #tpu.memory_space<vmem>>, vector<32x384xf32>
    %cst = arith.constant dense<0.000000e+00> : vector<16x384xf32>
    %3 = tpu.matmul %1, %2, %cst {dimension_numbers = #tpu.dot_dimension_numbers<[1], [0], [0], [1], [0, 0, 1, 1], [], []>} : vector<16x32xf32>, vector<32x384xf32>, vector<16x384xf32> -> vector<16x384xf32>
    %c0_4 = arith.constant 0 : index
    %c0_5 = arith.constant 0 : index
    %4 = vector.load %arg2[%c0_4, %c0_5] : memref<1x384xf32, #tpu.memory_space<vmem>>, vector<1x384xf32>
    %5 = vector.broadcast %4 : vector<1x384xf32> to vector<16x384xf32>
    %6 = arith.addf %3, %5 : vector<16x384xf32>
    %7 = vector.extract_strided_slice %6 {offsets = [0, 0], sizes = [16, 128], strides = [1, 1]} : vector<16x384xf32> to vector<16x128xf32>
    %8 = vector.shape_cast %7 : vector<16x128xf32> to vector<2x8x128xf32>
    %9 = vector.extract_strided_slice %6 {offsets = [0, 128], sizes = [16, 128], strides = [1, 1]} : vector<16x384xf32> to vector<16x128xf32>
    %10 = vector.shape_cast %9 : vector<16x128xf32> to vector<2x8x128xf32>
    %11 = vector.extract_strided_slice %6 {offsets = [0, 256], sizes = [16, 128], strides = [1, 1]} : vector<16x384xf32> to vector<16x128xf32>
    %12 = vector.shape_cast %11 : vector<16x128xf32> to vector<2x8x128xf32>
    %cst_6 = arith.constant dense<0.000000e+00> : vector<2x8x8xf32>
    %13 = tpu.matmul %8, %10, %cst_6 {dimension_numbers = #tpu.dot_dimension_numbers<[2], [2], [1], [1], [0, 0, 0, 1, 1, 1], [0], [0]>} : vector<2x8x128xf32>, vector<2x8x128xf32>, vector<2x8x8xf32> -> vector<2x8x8xf32>
    %cst_7 = arith.constant dense<0xFF800000> : vector<2x8xf32>
    %14 = vector.multi_reduction <maximumf>, %13, %cst_7 [2] : vector<2x8x8xf32> to vector<2x8xf32>
    %15 = vector.shape_cast %14 : vector<2x8xf32> to vector<2x8x1xf32>
    %16 = vector.broadcast %15 : vector<2x8x1xf32> to vector<2x8x8xf32>
    %17 = arith.subf %13, %16 : vector<2x8x8xf32>
    %18 = math.exp %17 : vector<2x8x8xf32>
    %cst_8 = arith.constant dense<0.000000e+00> : vector<2x8xf32>
    %19 = vector.multi_reduction <add>, %18, %cst_8 [2] : vector<2x8x8xf32> to vector<2x8xf32>
    %20 = vector.shape_cast %19 : vector<2x8xf32> to vector<2x8x1xf32>
    %21 = vector.broadcast %20 : vector<2x8x1xf32> to vector<2x8x8xf32>
    %22 = arith.divf %18, %21 : vector<2x8x8xf32>
    %cst_9 = arith.constant dense<0.000000e+00> : vector<2x8x128xf32>
    %23 = tpu.matmul %22, %12, %cst_9 {dimension_numbers = #tpu.dot_dimension_numbers<[2], [1], [1], [2], [0, 0, 0, 1, 1, 2], [0], [0]>} : vector<2x8x8xf32>, vector<2x8x128xf32>, vector<2x8x128xf32> -> vector<2x8x128xf32>
    %24 = vector.extract_strided_slice %23 {offsets = [0, 0, 0], sizes = [2, 8, 64], strides = [1, 1, 1]} : vector<2x8x128xf32> to vector<2x8x64xf32>
    %c0_10 = arith.constant 0 : index
    %c0_11 = arith.constant 0 : index
    %c0_12 = arith.constant 0 : index
    %25 = vector.load %arg3[%c0_10, %c0_11, %c0_12] : memref<2x8x64xf32, #tpu.memory_space<vmem>>, vector<2x8x64xf32>
    tpu.vector_store %arg3[%c0_10, %c0_11, %c0_12], %24 {strides = array<i32>} : memref<2x8x64xf32, #tpu.memory_space<vmem>>, vector<2x8x64xf32>,
    %c0_13 = arith.constant 0 : index
    %c0_14 = arith.constant 0 : index
    %c0_15 = arith.constant 0 : index
    %26 = vector.load %arg4[%c0_13, %c0_14, %c0_15] : memref<2x8x8xf32, #tpu.memory_space<vmem>>, vector<2x8x8xf32>
    tpu.vector_store %arg4[%c0_13, %c0_14, %c0_15], %22 {strides = array<i32>} : memref<2x8x8xf32, #tpu.memory_space<vmem>>, vector<2x8x8xf32>,
    return
  }
}

</mosaic_0001>

<bundles_post_ra>
// kernel: tpu_custom_call.1
= control target key start
LH: loop header
LB: loop body
LE: loop exit
PB: predicated region body
PF: predicated region fallthrough
CT: control target
= control target key end

     0   :  { %10 = vsyncpa [#allocation3], 0  ;;  %s564_s0 = inlined_call_operand.hbm [shape: f32[2,8,32], index: 0, kind: input, shape index: {}]   ;;  %s565_s1 = inlined_call_operand.hbm [shape: f32[32,384], index: 1, kind: input, shape index: {}]   ;;  %s566_s2 = inlined_call_operand.hbm [shape: f32[1,384], index: 2, kind: input, shape index: {}]   ;;  %s567_s3 = inlined_call_operand.hbm [shape: f32[2,8,64], index: 3, kind: output, shape index: {0}]   ;;  %s568_s4 = inlined_call_operand.hbm [shape: f32[2,8,8], index: 4, kind: output, shape index: {1}]  }
   0x1   :  { %11 = vsyncpa [#allocation6], 0 }
   0x2   :  { %12 = vsyncpa [#allocation4], 0  ;;  %s31_s17 = sshll.u32 %s565_s1, 4  ;;  %s32_s17 = int_to_ptr.hbm [resolvable:$true] %s31_s17 }
   0x3   :  { %13 = vsyncpa [#allocation10], 0  ;;  %s492_s18 = smov [#allocation5]   ;;  %s18_s22 = sshll.u32 %s564_s0, 4  ;;  %s19_s22 = int_to_ptr.hbm [resolvable:$true] %s18_s22 }
   0x4   :  { %s33_s19 = sshll.u32 %s492_s18, 4  ;;  %s493_s23 = smov 384   ;;  %s34_s19 = int_to_ptr.vmem [resolvable:$true] %s33_s19 }
   0x5   :  { %s494_s24 = smov 24   ;;  %s495_s25 = smov [#allocation2]  }
   0x6   :  { %39 = dma.hbm_to_vmem [thread:$0]  %s32_s17, 1536, %s34_s19, [#allocation6], %s493_s23, %s493_s23, %s494_s24  }
   0x7   :  { %s20_s26 = sshll.u32 %s495_s25, 4  ;;  %s496_s27 = smov 128   ;;  %s21_s26 = int_to_ptr.vmem [resolvable:$true] %s20_s26 }
   0x8   :  { %s497_s28 = smov 8   ;;  %s45_s30 = sshll.u32 %s566_s2, 4  ;;  %s46_s30 = int_to_ptr.hbm [resolvable:$true] %s45_s30 }
   0x9   :  { %26 = dma.hbm_to_vmem [thread:$0]  %s19_s22, 256, %s21_s26, [#allocation3], %s496_s27, %s496_s27, %s497_s28  }
   0xa   :  { %s498_s5 = smov [#allocation7]  }
   0xb   :  { %s47_s0 = sshll.u32 %s498_s5, 4  ;;  %s48_s0 = int_to_ptr.vmem [resolvable:$true] %s47_s0 }
   0xc   :  { %50 = dma.hbm_to_vmem [thread:$0]  %s46_s30, 48, %s48_s0, [#allocation6]  }
   0xd   :  { %484 = dma.done.wait [#allocation3], 256  }
   0xe   :  { %485 = vsyncadd [#allocation3], 4294967040 }
   0xf   :  { %486 = dma.done.wait [#allocation6], 1584  }
  0x10   :  { %487 = vsyncadd [#allocation6], 4294965712  ;;  %v75_v0 = vld [vmem:[#allocation5 + $0x50] sm:$0xff]  ;;  %v72_v1 = vld [vmem:[#allocation5 + $0x38] sm:$0xff]  ;;  %vm85_vm0 = vcmask 261120   ;;  %vm201_vm1 = vcmask 64512  }
  0x11   :  { %v74_v2 = vld [vmem:[#allocation5 + $0x48] sm:$0xff]  ;;  %127 = vmatpush.msra.mxu1 %v75_v0  ;;  %v71_v3 = vld [vmem:[#allocation5 + $0x30] sm:$0xff]  ;;  %v69_v4 = vld [vmem:[#allocation5 + $0x20] sm:$0xff]  ;;  %s499_s2 = smov [#allocation9]   ;;  %s320_s9 = sshll.u32 %s568_s4, 4  ;;  %vm296_vm10 = vcmask 523264   ;;  %s321_s9 = int_to_ptr.hbm [resolvable:$true] %s320_s9 }
  0x12   :  { %104 = vmatpush.msra.mxu0 %v74_v2  ;;  %v68_v5 = vld [vmem:[#allocation5 + $0x18] sm:$0xff]  ;;  %v66_v6 = vld [vmem:[#allocation5 + $0x8] sm:$0xff]  ;;  %v65_v7 = vld [vmem:[#allocation5] sm:$0xff]  ;;  %s318_s6 = sshll.u32 %s499_s2, 4  ;;  %s500_s10 = smov [#allocation8]   ;;  %s319_s6 = int_to_ptr.vmem [resolvable:$true] %s318_s6 }
  0x13   :  { %128 = vmatpush.msra.mxu1 %v72_v1  ;;  %v63_v8 = vld [vmem:[#allocation2] sm:$0xff]  ;;  %v64_v9 = vld [vmem:[#allocation2 + $0x8] sm:$0xff]  ;;  %v77_v10 = vld [vmem:[#allocation7] sm:$0x7]  ;;  %s305_s11 = sshll.u32 %s500_s10, 4  ;;  %s307_s14 = sshll.u32 %s567_s3, 4  ;;  %s306_s11 = int_to_ptr.vmem [resolvable:$true] %s305_s11  ;;  %s308_s14 = int_to_ptr.hbm [resolvable:$true] %s307_s14 }
  0x14   :  { %105 = vmatpush.msra.mxu0 %v71_v3  ;;  %v80_v11 = vperm.slane %v77_v10, 1  ;;  %v79_v12 = vperm.slane %v77_v10, 0  ;;  %v76_v21 = vld [vmem:[#allocation5 + $0x58] sm:$0xff]  ;;  %v73_v22 = vld [vmem:[#allocation5 + $0x40] sm:$0xff]  ;;  %v70_v23 = vld [vmem:[#allocation5 + $0x28] sm:$0xff]  ;;  %v81_v39 = vperm.slane %v77_v10, 2 }
  0x15   :  { %129 = vmatpush.msra.mxu1 %v69_v4  ;;  %150 = vmatpush.msra.mxu2 %v76_v21  ;;  %v67_v28 = vld [vmem:[#allocation5 + $0x10] sm:$0xff] }
  0x16   :  { %106 = vmatpush.msra.mxu0 %v68_v5 }
  0x17   :  { %130 = vmatpush.msra.mxu1 %v66_v6  ;;  %151 = vmatpush.msra.mxu2 %v73_v22 }
  0x18   :  { %107 = vmatpush.msra.mxu0 %v65_v7  ;;  %341 = vmatmul.msk.f32.vlgmr.msra.gmra.mxu1 %vm85_vm0, %v63_v8 }
  0x19   :  { %339 = vmatmul.msk.f32.vlgmr.msra.gmra.mxu0 %vm85_vm0, %v63_v8  ;;  %152 = vmatpush.msra.mxu2 %v70_v23 }
  0x1b   :  { %153 = vmatpush.msra.mxu2 %v67_v28 }
  0x1c   :  { %343 = vmatmul.msk.f32.vlgmr.msra.gmra.mxu2 %vm85_vm0, %v63_v8 }
  0x20   :  { %342 = vmatmul.msk.f32.gmra.mxu1 %vm85_vm0, %v64_v9 }
  0x21   :  { %340 = vmatmul.msk.f32.gmra.mxu0 %vm85_vm0, %v64_v9 }
  0x24   :  { %344 = vmatmul.msk.f32.gmra.mxu2 %vm85_vm0, %v64_v9 }
  0x95   :  { %v132_v13 = vpop.f32.mrf.mxu1 }
  0x96   :  { %v109_v14 = vpop.f32.mrf.mxu0  ;;  %v133_v15 = vadd.f32 %v132_v13, %v80_v11 }
  0x97   :  { %v110_v16 = vadd.f32 %v109_v14, %v79_v12 }
  0x98   :  { %176 = vmatpush.xpose.msra.mxu3 %v133_v15 }
  0x9b   :  { %177 = vmatmul.f32.vlgmr.msra.gmra.mxu3 %v110_v16 }
  0x9d   :  { %v135_v17 = vpop.f32.mrf.mxu1 }
  0x9e   :  { %v112_v18 = vpop.f32.mrf.mxu0  ;;  %v136_v19 = vadd.f32 %v135_v17, %v80_v11 }
  0x9f   :  { %v113_v20 = vadd.f32 %v112_v18, %v79_v12  ;;  %v155_v40 = vpop.f32.mrf.mxu2 }
  0xa0   :  { %196 = vmatpush.xpose.msrb.mxu3 %v136_v19  ;;  %v156_v41 = vadd.f32 %v155_v40, %v81_v39 }
  0xa3   :  { %197 = vmatmul.f32.vlgmr.msrb.gmra.mxu3 %v113_v20 }
  0xa4   :  { %268 = vmatpush.msra.mxu3 %v156_v41 }
  0xa7   :  { %v158_v42 = vpop.f32.mrf.mxu2 }
  0xa8   :  { %v159_v43 = vadd.f32 %v158_v42, %v81_v39 }
  0xaa   :  { %291 = vmatpush.msrb.mxu0 %v159_v43 }
 0x11e   :  { %v178_v24 = vpop.f32.mrf.mxu3 }
 0x11f   :  { %v202_v25 = vsel %vm201_vm1, %v178_v24, -inf }
 0x120   :  { %203 = vmax.xlane.f32.xlu0 %v202_v25 }
 0x126   :  { %v198_v26 = vpop.f32.mrf.mxu3 }
 0x127   :  { %v205_v27 = vsel %vm201_vm1, %v198_v26, -inf }
 0x128   :  { %206 = vmax.xlane.f32.xlu0 %v205_v27 }
 0x193   :  { %v204_v29 = vpop.xlane.xlu0 %203 }
 0x194   :  { %v208_v30 = vsub.f32 %v178_v24, %v204_v29 }
 0x196   :  { %v210_v31 = vmul.f32 1.442695, %v208_v30 }
 0x198   :  { %356 = vpow2.f32 %v210_v31 }
 0x19b   :  { %v207_v32 = vpop.xlane.xlu0 %206 }
 0x19c   :  { %v209_v33 = vsub.f32 %v198_v26, %v207_v32 }
 0x19e   :  { %v357_v34 = vpop.eup %356  ;;  %v212_v35 = vmul.f32 1.442695, %v209_v33 }
 0x19f   :  { %v214_v36 = vsel %vm201_vm1, %v357_v34, 0.0 }
 0x1a0   :  { %358 = vpow2.f32 %v212_v35  ;;  %215 = vadd.xlane.f32.xlu1 %v214_v36 }
 0x1a6   :  { %v359_v37 = vpop.eup %358 }
 0x1a7   :  { %v217_v38 = vsel %vm201_vm1, %v359_v37, 0.0 }
 0x1a8   :  { %218 = vadd.xlane.f32.xlu1 %v217_v38 }
 0x213   :  { %v216_v44 = vpop.xlane.xlu1 %215 }
 0x214   :  { %360 = vrcp.f32 %v216_v44  ;;  %v231_v49 = vand.u32 2147483648, %v216_v44  ;;  %v229_v51 = vand.u32 2147483647, %v216_v44  ;;  %vm225_vm3 = vweird.f32 %v216_v44 }
 0x216   :  { %v232_v54 = vor.u32 1.1754944e-38, %v231_v49  ;;  %vm230_vm5 = vcmp.eq.f32.partialorder %v229_v51, 8.507059e+37 }
 0x21a   :  { %v361_v45 = vpop.eup %360 }
 0x21b   :  { %v221_v46 = vmul.f32 %v361_v45, %v216_v44  ;;  %v219_v47 = vpop.xlane.xlu1 %218  ;;  %vm226_vm2 = vweird.f32 %v361_v45 }
 0x21c   :  { %362 = vrcp.f32 %v219_v47  ;;  %vm227_vm4 = vmor %vm225_vm3, %vm226_vm2  ;;  %v246_v60 = vand.u32 2147483648, %v219_v47  ;;  %v244_v62 = vand.u32 2147483647, %v219_v47  ;;  %vm240_vm7 = vweird.f32 %v219_v47 }
 0x21d   :  { %v222_v48 = vsub.f32 1.0, %v221_v46 }
 0x21e   :  { %v247_v0 = vor.u32 1.1754944e-38, %v246_v60  ;;  %vm245_vm9 = vcmp.eq.f32.partialorder %v244_v62, 8.507059e+37 }
 0x21f   :  { %v223_v50 = vmul.f32 %v361_v45, %v222_v48 }
 0x221   :  { %v224_v52 = vadd.f32 %v361_v45, %v223_v50 }
 0x222   :  { %v363_v53 = vpop.eup %362 }
 0x223   :  { %v228_v55 = vsel %vm227_vm4, %v361_v45, %v224_v52  ;;  %v236_v56 = vmul.f32 %v363_v53, %v219_v47  ;;  %vm241_vm6 = vweird.f32 %v363_v53 }
 0x224   :  { %v233_v57 = vsel %vm230_vm5, %v232_v54, %v228_v55  ;;  %vm242_vm8 = vmor %vm240_vm7, %vm241_vm6 }
 0x225   :  { %v237_v58 = vsub.f32 1.0, %v236_v56  ;;  %v234_v59 = vmul.f32 %v357_v34, %v233_v57 }
 0x227   :  { %v238_v61 = vmul.f32 %v363_v53, %v237_v58  ;;  %345 = vmatmul.msk.f32.vlgmr.msra.gmra.mxu3 %vm201_vm1, %v234_v59  ;;  %299 = vst.msk [vmem:[#allocation9] sm:$0xff] %vm201_vm1, %v234_v59 }
 0x229   :  { %v239_v63 = vadd.f32 %v363_v53, %v238_v61 }
 0x22b   :  { %v243_v1 = vsel %vm242_vm8, %v363_v53, %v239_v63 }
 0x22c   :  { %v248_v2 = vsel %vm245_vm9, %v247_v0, %v243_v1 }
 0x22d   :  { %v249_v3 = vmul.f32 %v359_v37, %v248_v2 }
 0x22f   :  { %346 = vmatmul.msk.f32.vlgmr.msrb.gmra.mxu0 %vm201_vm1, %v249_v3  ;;  %300 = vst.msk [vmem:[#allocation9 + $0x8] sm:$0xff] %vm201_vm1, %v249_v3 }
 0x230   :  { %326 = dma.vmem_to_hbm [thread:$0]  %s319_s6, 256, %s321_s9, [#allocation10], %s496_s27, %s496_s27, %s497_s28  }
 0x2aa   :  { %v270_v4 = vpop.f32.mrf.mxu3 }
 0x2ab   :  { %297 = vst.msk [vmem:[#allocation8] sm:$0xff] %vm296_vm10, %v270_v4 }
 0x2ac   :  { %v293_v5 = vpop.f32.mrf.mxu0 }
 0x2ad   :  { %298 = vst.msk [vmem:[#allocation8 + $0x8] sm:$0xff] %vm296_vm10, %v293_v5 }
 0x2ae   :  { %313 = dma.vmem_to_hbm [thread:$0]  %s306_s11, 256, %s308_s14, [#allocation4], %s496_s27, %s496_s27, %s497_s28  }
 0x2af   :  { %488 = dma.done.wait [#allocation4], 256  }
 0x2b0   :  { %489 = vsyncadd [#allocation4], 4294967040 }
 0x2b1   :  { %490 = dma.done.wait [#allocation10], 256  }
 0x2b2   :  { %491 = vsyncadd [#allocation10], 4294967040 }
 0x2b3   :  { %335 = vsyncpa [#allocation3], 1 }
 0x2b4   :  { %336 = vsyncpa [#allocation6], 1 }
 0x2b5   :  { %337 = vsyncpa [#allocation4], 1 }
 0x2b6   :  { %338 = vsyncpa [#allocation10], 1 }

</bundles_post_ra>
